<compile_context>
chip_gen: v6e
topology: v6e:2x2x1
jax: 0.10.0
libtpu: 0.0.40
codegen_flags: <defaults>
</compile_context>

<pallas_src>
import functools

import jax
import jax.numpy as jnp
from jax.experimental import pallas as pl
from jax.experimental.pallas import tpu as pltpu


def _complex_conv1d_kernel(x_ref, w_ref, b_ref, out_ref, acc_ref, *, K, W_out):
    # x_ref  : (2Cin, W_ext)      lane-dense input slab (batch folded on lanes),
    #                             conv padding + (K-1) tail columns pre-applied.
    # w_ref  : (K, 2Cout, 2Cin)   per-tap block-complex weights.
    # b_ref  : (2Cout, 1)         combined bias [b_re - b_im ; b_re + b_im].
    # out_ref: (2Cout, W_out)     lane-dense output slab.
    # acc_ref: (2Cout, W_out) f32 accumulator scratch.
    x = x_ref[...]                                       # single full-slab load
    acc_ref[...] = jnp.dot(w_ref[0], x[:, :W_out],
                           preferred_element_type=jnp.float32)
    for k in range(1, K):                                # K small & static: unrolled taps
        acc_ref[...] += jnp.dot(w_ref[k], x[:, k:k + W_out],
                                preferred_element_type=jnp.float32)
    out_ref[...] = (acc_ref[...] + b_ref[...]).astype(out_ref.dtype)


def _pick_batch_block(B, Lpad, C2in, C2out, K):
    """Largest divisor of B whose per-step working set fits a conservative VMEM
    budget; back off to G>=2 when that still gives a >=512-lane output slab."""
    budget = 8 << 20          # conservative across v5e/v6e/v7x, leaves pipeline headroom
    best = 1
    for d in range(1, B + 1):
        if B % d:
            continue
        w_out = d * Lpad
        w_ext = w_out + K - 1
        step_bytes = 4 * (2 * C2in * w_ext       # input  (double-buffered)
                          + 2 * C2out * w_out    # output (double-buffered)
                          + C2out * w_out)       # f32 accumulator scratch
        if step_bytes <= budget:
            best = d
    if best == B and B % 2 == 0 and (B // 2) * Lpad >= 512:
        best = B // 2         # keep both v7x TensorCores busy when lane width permits
    return best


def complex_conv1d(x, w_re, w_im, b_re, b_im, *, padding=0, batch_block=None):
    """ComplexConv forward.

    x    : (B, 2*Cin, L)  float32
    w_re : (Cout, Cin, K) float32   (nn.Conv1d weight layout)
    w_im : (Cout, Cin, K) float32
    b_re : (Cout,)        float32
    b_im : (Cout,)        float32
    returns (B, 2*Cout, Lout) with Lout = L + 2*padding - K + 1
    """
    B, C2in, L = x.shape
    Cout, _, K = w_re.shape
    C2out = 2 * Cout
    Lpad = L + 2 * padding
    Lout = Lpad - K + 1

    if batch_block is None:
        batch_block = _pick_batch_block(B, Lpad, C2in, C2out, K)
    assert B % batch_block == 0, "batch_block must divide B"
    G = B // batch_block
    W_out = batch_block * Lpad          # folded lane width of the output slab
    W_ext = W_out + (K - 1)             # + tail columns so every tap slice is in-bounds

    # ---- wrapper-side layout plumbing (one fused XLA pass over x) ----------
    xpad = jnp.pad(x, ((0, 0), (0, 0), (padding, padding)))          # (B, 2Cin, Lpad)
    x_slab = (xpad.reshape(G, batch_block, C2in, Lpad)
                  .transpose(0, 2, 1, 3)
                  .reshape(G, C2in, W_out))
    x_slab = jnp.pad(x_slab, ((0, 0), (0, 0), (0, K - 1)))           # (G, 2Cin, W_ext)

    # Block-complex per-tap weights [[Wr,-Wi],[Wi,Wr]] -> (K, 2Cout, 2Cin).
    top = jnp.concatenate([w_re, -w_im], axis=1)                     # (Cout, 2Cin, K)
    bot = jnp.concatenate([w_im, w_re], axis=1)                      # (Cout, 2Cin, K)
    w_taps = jnp.transpose(jnp.concatenate([top, bot], axis=0), (2, 0, 1))
    b_slab = jnp.concatenate([b_re - b_im, b_re + b_im]).reshape(C2out, 1)

    kernel = functools.partial(_complex_conv1d_kernel, K=K, W_out=W_out)

    # Explicit VMEM budget: double-buffered in/out + scratch + weights, capped
    # at v7x's 64 MiB per-TC physical VMEM.
    step_bytes = 4 * (2 * C2in * W_ext + 2 * C2out * W_out + C2out * W_out
                      + 2 * K * C2out * C2in + 2 * C2out)
    vmem_limit = int(min(max(2 * step_bytes, 16 << 20), 64 << 20))

    out_slab = pl.pallas_call(
        kernel,
        out_shape=jax.ShapeDtypeStruct((G, C2out, W_out), x.dtype),
        grid_spec=pltpu.PrefetchScalarGridSpec(
            num_scalar_prefetch=0,
            grid=(G,),
            in_specs=[
                pl.BlockSpec((None, C2in, W_ext), lambda g: (g, 0, 0)),
                pl.BlockSpec((K, C2out, C2in), lambda g: (0, 0, 0)),
                pl.BlockSpec((C2out, 1), lambda g: (0, 0)),
            ],
            out_specs=pl.BlockSpec((None, C2out, W_out), lambda g: (g, 0, 0)),
            scratch_shapes=[pltpu.VMEM((C2out, W_out), jnp.float32)],
        ),
        compiler_params=pltpu.CompilerParams(
            dimension_semantics=("parallel",),
            vmem_limit_bytes=vmem_limit),
    )(x_slab, w_taps, b_slab)

    # Un-fold batch from the lane axis and drop each segment's (K-1) tail cols.
    out = out_slab.reshape(G, C2out, batch_block, Lpad)[..., :Lout]
    out = jnp.transpose(out, (0, 2, 1, 3)).reshape(B, C2out, Lout)
    return out


def _reference(x, w_re, w_im, b_re, b_im, padding):
    """Pure-JAX reference using lax.conv_general_dilated (NCL / OIK)."""
    Cin = x.shape[1] // 2
    x_real, x_imag = x[:, :Cin, :], x[:, Cin:, :]
    dn = jax.lax.conv_dimension_numbers(x_real.shape, w_re.shape,
                                        ("NCH", "OIH", "NCH"))

    def conv(inp, w, b):
        y = jax.lax.conv_general_dilated(inp, w, (1,), [(padding, padding)],
                                         dimension_numbers=dn)
        return y + b[None, :, None]

    real = conv(x_real, w_re, b_re) - conv(x_imag, w_im, b_im)
    imag = conv(x_imag, w_re, b_re) + conv(x_real, w_im, b_im)
    return jnp.concatenate([real, imag], axis=1)


if __name__ == "__main__":
    # Module config: ComplexConv(in_channels=4, out_channels=8, kernel_size=3, padding=1)
    B, Cin, Cout, K, L, padding = 2, 4, 8, 3, 16, 1

    key = jax.random.PRNGKey(0)
    k_x, k_wr, k_wi, k_br, k_bi = jax.random.split(key, 5)

    x = jax.random.normal(k_x, (B, 2 * Cin, L), dtype=jnp.float32)
    w_re = jax.random.normal(k_wr, (Cout, Cin, K), dtype=jnp.float32) * 0.1
    w_im = jax.random.normal(k_wi, (Cout, Cin, K), dtype=jnp.float32) * 0.1
    b_re = jax.random.normal(k_br, (Cout,), dtype=jnp.float32) * 0.1
    b_im = jax.random.normal(k_bi, (Cout,), dtype=jnp.float32) * 0.1

    out = complex_conv1d(x, w_re, w_im, b_re, b_im, padding=padding)
    out = jax.block_until_ready(out)

    ref = jax.block_until_ready(_reference(x, w_re, w_im, b_re, b_im, padding))
    assert out.shape == (B, 2 * Cout, L + 2 * padding - K + 1), out.shape
    assert jnp.allclose(out, ref, atol=1e-5, rtol=1e-5), "mismatch vs reference"

    # Extra check exercising G > 1 (multiple grid steps) and the batch un-fold.
    B2 = 4
    x2 = jax.random.normal(jax.random.PRNGKey(1), (B2, 2 * Cin, L), dtype=jnp.float32)
    out2 = jax.block_until_ready(
        complex_conv1d(x2, w_re, w_im, b_re, b_im, padding=padding, batch_block=2))
    ref2 = jax.block_until_ready(_reference(x2, w_re, w_im, b_re, b_im, padding))
    assert jnp.allclose(out2, ref2, atol=1e-5, rtol=1e-5), "mismatch vs reference (G>1)"

    print("KERNEL_OK")
</pallas_src>

<mosaic_0001>
module attributes {stable_mosaic.version = 11 : i64} {
  func.func @_complex_conv1d_kernel(%arg0: i32, %arg1: memref<1x8x38xf32, #tpu.memory_space<vmem>>, %arg2: memref<3x16x8xf32, #tpu.memory_space<vmem>>, %arg3: memref<16x1xf32, #tpu.memory_space<vmem>>, %arg4: memref<1x16x36xf32, #tpu.memory_space<vmem>>, %arg5: memref<16x36xf32, #tpu.memory_space<vmem>>) attributes {dimension_semantics = [#tpu.dimension_semantics<parallel>], iteration_bounds = array<i64: 1>, scalar_prefetch = 0 : i64, scratch_operands = 1 : i64, tpu.core_type = #tpu.core_type<tc>, window_params = [{transform_indices = @transform_0, window_bounds = array<i64: 1, 8, 38>}, {pipeline_mode = #tpu.pipeline_mode<synchronous>, transform_indices = @transform_1, window_bounds = array<i64: 3, 16, 8>}, {pipeline_mode = #tpu.pipeline_mode<synchronous>, transform_indices = @transform_2, window_bounds = array<i64: 16, 1>}, {transform_indices = @transform_3, window_bounds = array<i64: 1, 16, 36>}]} {
    %c0 = arith.constant 0 : index
    %c0_0 = arith.constant 0 : index
    %c0_1 = arith.constant 0 : index
    %0 = vector.load %arg1[%c0, %c0_0, %c0_1] : memref<1x8x38xf32, #tpu.memory_space<vmem>>, vector<1x8x38xf32>
    %1 = vector.shape_cast %0 : vector<1x8x38xf32> to vector<8x38xf32>
    %c0_2 = arith.constant 0 : index
    %c0_3 = arith.constant 0 : index
    %c0_4 = arith.constant 0 : index
    %2 = vector.load %arg2[%c0_2, %c0_3, %c0_4] : memref<3x16x8xf32, #tpu.memory_space<vmem>>, vector<1x16x8xf32>
    %3 = vector.shape_cast %2 : vector<1x16x8xf32> to vector<16x8xf32>
    %4 = vector.extract_strided_slice %1 {offsets = [0, 0], sizes = [8, 36], strides = [1, 1]} : vector<8x38xf32> to vector<8x36xf32>
    %cst = arith.constant dense<0.000000e+00> : vector<16x36xf32>
    %5 = tpu.matmul %3, %4, %cst {dimension_numbers = #tpu.dot_dimension_numbers<[1], [0], [0], [1], [0, 0, 1, 1], [], []>} : vector<16x8xf32>, vector<8x36xf32>, vector<16x36xf32> -> vector<16x36xf32>
    %c0_5 = arith.constant 0 : index
    %c0_6 = arith.constant 0 : index
    %6 = vector.load %arg5[%c0_5, %c0_6] : memref<16x36xf32, #tpu.memory_space<vmem>>, vector<16x36xf32>
    tpu.vector_store %arg5[%c0_5, %c0_6], %5 {strides = array<i32>} : memref<16x36xf32, #tpu.memory_space<vmem>>, vector<16x36xf32>,
    %c0_7 = arith.constant 0 : index
    %c0_8 = arith.constant 0 : index
    %7 = vector.load %arg5[%c0_7, %c0_8] : memref<16x36xf32, #tpu.memory_space<vmem>>, vector<16x36xf32>
    %c1 = arith.constant 1 : index
    %c0_9 = arith.constant 0 : index
    %c0_10 = arith.constant 0 : index
    %8 = vector.load %arg2[%c1, %c0_9, %c0_10] : memref<3x16x8xf32, #tpu.memory_space<vmem>>, vector<1x16x8xf32>
    %9 = vector.shape_cast %8 : vector<1x16x8xf32> to vector<16x8xf32>
    %10 = vector.extract_strided_slice %1 {offsets = [0, 1], sizes = [8, 36], strides = [1, 1]} : vector<8x38xf32> to vector<8x36xf32>
    %cst_11 = arith.constant dense<0.000000e+00> : vector<16x36xf32>
    %11 = tpu.matmul %9, %10, %cst_11 {dimension_numbers = #tpu.dot_dimension_numbers<[1], [0], [0], [1], [0, 0, 1, 1], [], []>} : vector<16x8xf32>, vector<8x36xf32>, vector<16x36xf32> -> vector<16x36xf32>
    %12 = arith.addf %7, %11 : vector<16x36xf32>
    %c0_12 = arith.constant 0 : index
    %c0_13 = arith.constant 0 : index
    %13 = vector.load %arg5[%c0_12, %c0_13] : memref<16x36xf32, #tpu.memory_space<vmem>>, vector<16x36xf32>
    tpu.vector_store %arg5[%c0_12, %c0_13], %12 {strides = array<i32>} : memref<16x36xf32, #tpu.memory_space<vmem>>, vector<16x36xf32>,
    %c0_14 = arith.constant 0 : index
    %c0_15 = arith.constant 0 : index
    %14 = vector.load %arg5[%c0_14, %c0_15] : memref<16x36xf32, #tpu.memory_space<vmem>>, vector<16x36xf32>
    %c2 = arith.constant 2 : index
    %c0_16 = arith.constant 0 : index
    %c0_17 = arith.constant 0 : index
    %15 = vector.load %arg2[%c2, %c0_16, %c0_17] : memref<3x16x8xf32, #tpu.memory_space<vmem>>, vector<1x16x8xf32>
    %16 = vector.shape_cast %15 : vector<1x16x8xf32> to vector<16x8xf32>
    %17 = vector.extract_strided_slice %1 {offsets = [0, 2], sizes = [8, 36], strides = [1, 1]} : vector<8x38xf32> to vector<8x36xf32>
    %cst_18 = arith.constant dense<0.000000e+00> : vector<16x36xf32>
    %18 = tpu.matmul %16, %17, %cst_18 {dimension_numbers = #tpu.dot_dimension_numbers<[1], [0], [0], [1], [0, 0, 1, 1], [], []>} : vector<16x8xf32>, vector<8x36xf32>, vector<16x36xf32> -> vector<16x36xf32>
    %19 = arith.addf %14, %18 : vector<16x36xf32>
    %c0_19 = arith.constant 0 : index
    %c0_20 = arith.constant 0 : index
    %20 = vector.load %arg5[%c0_19, %c0_20] : memref<16x36xf32, #tpu.memory_space<vmem>>, vector<16x36xf32>
    tpu.vector_store %arg5[%c0_19, %c0_20], %19 {strides = array<i32>} : memref<16x36xf32, #tpu.memory_space<vmem>>, vector<16x36xf32>,
    %c0_21 = arith.constant 0 : index
    %c0_22 = arith.constant 0 : index
    %21 = vector.load %arg5[%c0_21, %c0_22] : memref<16x36xf32, #tpu.memory_space<vmem>>, vector<16x36xf32>
    %c0_23 = arith.constant 0 : index
    %c0_24 = arith.constant 0 : index
    %22 = vector.load %arg3[%c0_23, %c0_24] : memref<16x1xf32, #tpu.memory_space<vmem>>, vector<16x1xf32>
    %23 = vector.broadcast %22 : vector<16x1xf32> to vector<16x36xf32>
    %24 = arith.addf %21, %23 : vector<16x36xf32>
    %c0_25 = arith.constant 0 : index
    %c0_26 = arith.constant 0 : index
    %c0_27 = arith.constant 0 : index
    %25 = vector.load %arg4[%c0_25, %c0_26, %c0_27] : memref<1x16x36xf32, #tpu.memory_space<vmem>>, vector<1x16x36xf32>
    %26 = vector.shape_cast %25 : vector<1x16x36xf32> to vector<16x36xf32>
    %27 = vector.shape_cast %24 : vector<16x36xf32> to vector<1x16x36xf32>
    tpu.vector_store %arg4[%c0_25, %c0_26, %c0_27], %27 {strides = array<i32>} : memref<1x16x36xf32, #tpu.memory_space<vmem>>, vector<1x16x36xf32>,
    return
  }
  func.func @transform_0(%arg0: i32) -> (i32, i32, i32) {
    %c0_i32 = arith.constant 0 : i32
    %c0_i32_0 = arith.constant 0 : i32
    %c0_i32_1 = arith.constant 0 : i32
    return %arg0, %c0_i32, %c0_i32_0 : i32, i32, i32
  }
  func.func @transform_1(%arg0: i32) -> (i32, i32, i32) {
    %c0_i32 = arith.constant 0 : i32
    %c0_i32_0 = arith.constant 0 : i32
    %c0_i32_1 = arith.constant 0 : i32
    %c0_i32_2 = arith.constant 0 : i32
    return %c0_i32, %c0_i32_0, %c0_i32_1 : i32, i32, i32
  }
  func.func @transform_2(%arg0: i32) -> (i32, i32) {
    %c0_i32 = arith.constant 0 : i32
    %c0_i32_0 = arith.constant 0 : i32
    %c0_i32_1 = arith.constant 0 : i32
    return %c0_i32, %c0_i32_0 : i32, i32
  }
  func.func @transform_3(%arg0: i32) -> (i32, i32, i32) {
    %c0_i32 = arith.constant 0 : i32
    %c0_i32_0 = arith.constant 0 : i32
    %c0_i32_1 = arith.constant 0 : i32
    return %arg0, %c0_i32, %c0_i32_0 : i32, i32, i32
  }
}

</mosaic_0001>

<bundles_post_ra>
// kernel: tpu_custom_call.1
= control target key start
LH: loop header
LB: loop body
LE: loop exit
PB: predicated region body
PF: predicated region fallthrough
CT: control target
= control target key end

     0   :  { %vm18_vm0 = vcmask 64512   ;;  %s388_s18 = smov 127   ;;  %s458_s0 = inlined_call_operand.vmem [shape: f32[1,8,38], index: 0, kind: input, shape index: {}]   ;;  %s459_s1 = inlined_call_operand.vmem [shape: f32[3,16,8], index: 1, kind: input, shape index: {}]   ;;  %s460_s2 = inlined_call_operand.vmem [shape: f32[16,1], index: 2, kind: input, shape index: {}]   ;;  %s461_s3 = inlined_call_operand.hbm [shape: f32[1,16,36], index: 3, kind: output, shape index: {}]  }
   0x1   :  { %v15_v0 = vld [vmem:[%s458_s0] sm:$0xff]  ;;  %v17_v2 = vld [vmem:[%s459_s1 + $0x8] sm:$0xff]  ;;  %v326_v3 = vld [vmem:[%s459_s1 + $0x10] sm:$0xff] }
   0x2   :  { %v16_v1 = vld [vmem:[%s459_s1] sm:$0xff]  ;;  %109 = vrot.lane.b32.xlu0 %v15_v0, %s388_s18  ;;  %343 = vmatprep.subr.mxu0 %v15_v0 }
   0x3   :  { %v330_v4 = vld [vmem:[%s459_s1 + $0x20] sm:$0xff]  ;;  %344 = vmatpush3.msra.mxu0 %v15_v0  ;;  %345 = vmatprep.mubr.msk.f32.mxu0 %vm18_vm0, %v16_v1 }
   0x4   :  { %v292_v5 = vld [vmem:[%s460_s2] sm:$0xff]  ;;  %346 = vmatmul.mubr.msk.f32.vlgmr.msra.gmra.mxu0 %vm18_vm0, %v17_v2  ;;  %350 = vmatprep.mubr.msk.f32.mxu1 %vm18_vm0, %v326_v3 }
   0x5   :  { %8 = vsyncpa [#allocation4], 0  ;;  %355 = vmatprep.mubr.msk.f32.mxu0 %vm18_vm0, %v330_v4  ;;  %v389_v6 = vmov 0   ;;  %s390_s24 = smov 126   ;;  %v293_v7 = vld [vmem:[%s460_s2 + $0x8] sm:$0xff]  ;;  %v327_v9 = vld [vmem:[%s459_s1 + $0x18] sm:$0xff] }
   0x6   :  { %364 = vset.pattern.permute.xlu1 %v389_v6  ;;  %202 = vrot.lane.b32.xlu0 %v15_v0, %s390_s24  ;;  %v331_v11 = vld [vmem:[%s459_s1 + $0x28] sm:$0xff]  ;;  %vm100_vm1 = vcmask 293888   ;;  %s391_s1 = smov [#allocation3]  }
   0x7   :  { %296 = vperm.xlu1 %364, %v292_v5   ;;  %365 = vset.pattern.permute.xlu0 %v389_v6  ;;  %s313_s2 = sshll.u32 %s391_s1, 4  ;;  %s314_s2 = int_to_ptr.vmem [resolvable:$true] %s313_s2 }
   0x8   :  { %s366_s4 = scalar_lea.vmem %s314_s2, 256  ;;  %p371_p1 = scmp.lt.s32.totalorder %s314_s2, %s314_s2 }
   0x9   :  { %p367_p0 = scmp.ne.s32.totalorder %s314_s2, %s366_s4  ;;  %p372_p2 = scmp.lt.s32.totalorder %s366_s4, %s366_s4 }
   0xb   :  { %301 = vperm.xlu1 %364, %v293_v7   ;;  %p373_p3 = por %p372_p2, %p371_p1 }
   0xd   :  { %p374_p4 = pnand %p373_p3, %p367_p0 }
  0x74   :  { %v110_v8 = vpop.permute.xlu0 %109 }
  0x75   :  { %348 = vmatprep.subr.mxu1 %v110_v8 }
  0x76   :  { %349 = vmatpush3.msra.mxu1 %v110_v8 }
  0x77   :  { %351 = vmatmul.mubr.msk.f32.vlgmr.msra.gmra.mxu1 %vm18_vm0, %v327_v9 }
  0x78   :  { %v203_v10 = vpop.permute.xlu0 %202 }
  0x79   :  { %353 = vmatprep.subr.mxu0 %v203_v10 }
  0x7a   :  { %354 = vmatpush3.msra.mxu0 %v203_v10 }
  0x7b   :  { %356 = vmatmul.mubr.msk.f32.vlgmr.msra.gmra.mxu0 %vm18_vm0, %v331_v11 }
  0x82   :  { %v297_v26 = vpop.permute.xlu1 %296 }
  0x86   :  { %v302_v27 = vpop.permute.xlu1 %301 }
  0xc4   :  { %v347_v12 = vpop.f32.mrf.mxu0 }
  0xc5   :  { %102 = vst.msk [vmem:[#allocation2 + $0x8] sm:$0xff] %vm100_vm1, %v347_v12 }
  0xc6   :  { %v91_v13 = vpop.f32.mrf.mxu0 }
  0xc7   :  { %101 = vst.msk [vmem:[#allocation2] sm:$0xff] %vm100_vm1, %v91_v13 }
  0xcc   :  { %v104_v14 = vld [vmem:[#allocation2 + $0x8] sm:$0xff] }
  0xce   :  { %v103_v17 = vld [vmem:[#allocation2] sm:$0xff] }
 0x137   :  { %v352_v15 = vpop.f32.mrf.mxu1 }
 0x138   :  { %v194_v16 = vadd.f32 %v352_v15, %v104_v14 }
 0x139   :  { %v184_v18 = vpop.f32.mrf.mxu1 }
 0x13a   :  { %196 = vst.msk [vmem:[#allocation2 + $0x8] sm:$0xff] %vm100_vm1, %v194_v16  ;;  %v193_v19 = vadd.f32 %v184_v18, %v103_v17 }
 0x13b   :  { %v357_v20 = vpop.f32.mrf.mxu0 }
 0x13c   :  { %195 = vst.msk [vmem:[#allocation2] sm:$0xff] %vm100_vm1, %v193_v19 }
 0x13d   :  { %v277_v24 = vpop.f32.mrf.mxu0 }
 0x141   :  { %v198_v21 = vld [vmem:[#allocation2 + $0x8] sm:$0xff] }
 0x142   :  { %v287_v22 = vadd.f32 %v357_v20, %v198_v21 }
 0x143   :  { %v197_v23 = vld [vmem:[#allocation2] sm:$0xff] }
 0x144   :  { %289 = vst.msk [vmem:[#allocation2 + $0x8] sm:$0xff] %vm100_vm1, %v287_v22  ;;  %v286_v25 = vadd.f32 %v277_v24, %v197_v23 }
 0x146   :  { %288 = vst.msk [vmem:[#allocation2] sm:$0xff] %vm100_vm1, %v286_v25 }
 0x14b   :  { %v291_v28 = vld [vmem:[#allocation2 + $0x8] sm:$0xff] }
 0x14c   :  { %v305_v29 = vadd.f32 %v302_v27, %v291_v28 }
 0x14d   :  { %v290_v30 = vld [vmem:[#allocation2] sm:$0xff] }
 0x14e   :  { %v304_v31 = vadd.f32 %v297_v26, %v290_v30  ;;  %307 = vst.msk [vmem:[#allocation3 + $0x8] sm:$0xff] %vm100_vm1, %v305_v29 }
 0x150   :  { %306 = vst.msk [vmem:[#allocation3] sm:$0xff] %vm100_vm1, %v304_v31 }
 0x151   :  { %377 = shalt.err (!%p374_p4)
}
 0x152   :  { %s392_s5 = smov 128   ;;  %s393_s6 = smov 8  }
 0x153   :  { %319 = dma.vmem_to_hbm [thread:$0]  %s314_s2, 256, %s461_s3, [#allocation4], %s392_s5, %s392_s5, %s393_s6  }
 0x154   :  { %386 = dma.done.wait [#allocation4], 256  }
 0x155   :  { %387 = vsyncadd [#allocation4], 4294967040 }
 0x156   :  { %323 = vsyncpa [#allocation4], 1 }

</bundles_post_ra>
